<compile_context>
chip_gen: v5e
topology: v5e:2x2
jax: 0.10.0
libtpu: 0.0.40
codegen_flags: <defaults>
</compile_context>

<pallas_src>
import functools

import jax
import jax.numpy as jnp
from jax import lax
from jax.experimental import pallas as pl
from jax.experimental.pallas import tpu as pltpu


# ----------------------------------------------------------------------------
# Tiling / budget helpers
# ----------------------------------------------------------------------------
def _round_up(x, m):
    return (x + m - 1) // m * m


def _ceil_div(a, b):
    return -(-a // b)


def _vmem_budget_bytes():
    """Per-generation VMEM budget: ~3/4 of physical, capped, safe fallback."""
    try:
        cap = int(pltpu.get_tpu_info().vmem_capacity_bytes)
    except Exception:
        cap = 64 * 1024 * 1024  # conservative (v7x-sized) fallback
    return int(min(cap * 3 // 4, 96 * 1024 * 1024))


def _auto_tk(hw, nc, itemsize, n_splits, vmem_budget, max_tk=2048):
    """Largest K tile (multiple of 128) that fits the double-buffered X slab."""
    per_split_min = _round_up(max(1, _ceil_div(hw, n_splits)), 128)
    # Reserve accumulator + staged gram_S + headroom, rest goes to X (x2 bufs).
    reserve = 3 * nc * nc * 4 + (1 << 20)
    avail = max(vmem_budget - reserve, 2 * 128 * nc * itemsize)
    cap = (avail // (2 * max(1, nc) * itemsize)) // 128 * 128
    cap = max(128, min(max_tk, cap))
    return int(min(cap, per_split_min))


def _prep_input(x, n_splits, tk, vmem_budget):
    """Flatten to (B, C, HW) and zero-pad HW to n_splits * kt * tk columns."""
    bs, nc, h, w = x.shape
    hw = h * w
    x_flat = x.reshape(bs, nc, hw)  # native dtype; no f32 upcast
    if tk is None:
        tk = _auto_tk(hw, nc, x_flat.dtype.itemsize, n_splits, vmem_budget)
    assert tk % 128 == 0, "tk must be a multiple of 128 (lane width)"
    per_split = _round_up(max(1, _ceil_div(hw, n_splits)), tk)
    hw_pad = per_split * n_splits
    if hw_pad != hw:
        # Zero columns contribute nothing to X @ X^T; inv_norm uses true h*w.
        x_flat = jnp.pad(x_flat, ((0, 0), (0, 0), (0, hw_pad - hw)))
    kt = per_split // tk
    return x_flat, tk, kt, hw_pad


def _default_n_splits(batch):
    """2-way HW split only on v7x-class chips (2 TCs) when B can't fill them."""
    try:
        kind = jax.devices()[0].device_kind.lower()
    except Exception:
        return 1
    if "v7" in kind and batch < 2:
        return 2
    return 1


# ----------------------------------------------------------------------------
# Kernels
# ----------------------------------------------------------------------------
def _gram_kernel(x_ref, gram_ref, *, inv_norm):
    """Per-(split, batch) partial gram, accumulated over the K (HW) grid axis."""
    k = pl.program_id(2)

    @pl.when(k == 0)
    def _():
        gram_ref[...] = jnp.zeros_like(gram_ref)

    x = x_ref[0]  # (C, tk) tile, native dtype
    # gram[i, j] += sum_d x[i, d] * x[j, d]  (NT matmul, contract on lanes)
    gram_ref[0, 0] += lax.dot_general(
        x, x, (((1,), (1,)), ((), ())),
        preferred_element_type=jnp.float32,
    )

    @pl.when(k == pl.num_programs(2) - 1)
    def _():
        gram_ref[...] = gram_ref[...] * inv_norm


def _style_sse_kernel(x_ref, gram_s_hbm, sse_ref,
                      gram_acc_ref, gram_s_vmem, copy_sem, *, inv_norm):
    """Per-batch sum((gram_S - gram(X))^2); gram(X) never leaves VMEM."""
    b = pl.program_id(0)
    k = pl.program_id(1)

    @pl.when(k == 0)
    def _():
        gram_acc_ref[...] = jnp.zeros_like(gram_acc_ref)
        sse_ref[...] = jnp.zeros_like(sse_ref)
        # Stage gram_S for this batch element once; overlaps with the K loop.
        pltpu.make_async_copy(gram_s_hbm.at[b], gram_s_vmem, copy_sem).start()

    x = x_ref[0]  # (C, tk) tile, native dtype
    gram_acc_ref[...] += lax.dot_general(
        x, x, (((1,), (1,)), ((), ())),
        preferred_element_type=jnp.float32,
    )

    @pl.when(k == pl.num_programs(1) - 1)
    def _():
        pltpu.make_async_copy(gram_s_hbm.at[b], gram_s_vmem, copy_sem).wait()
        diff = gram_s_vmem[...] - gram_acc_ref[...] * inv_norm
        sse_ref[...] += jnp.sum(diff * diff)


# ----------------------------------------------------------------------------
# Wrappers
# ----------------------------------------------------------------------------
def gram_pallas(x, tk=None, n_splits=1):
    """gram(x) with the PyTorch normalization, shape (B, C, C) float32."""
    bs, nc, h, w = x.shape
    budget = _vmem_budget_bytes()
    x_flat, tk, kt, hw_pad = _prep_input(x, n_splits, tk, budget)
    itemsize = x_flat.dtype.itemsize
    inv_norm = 1.0 / float(bs * nc * h * w)

    kernel = functools.partial(_gram_kernel, inv_norm=inv_norm)
    cost = pl.CostEstimate(
        flops=2 * bs * nc * nc * hw_pad,
        transcendentals=0,
        bytes_accessed=bs * nc * hw_pad * itemsize + n_splits * bs * nc * nc * 4,
    )
    out = pl.pallas_call(
        kernel,
        out_shape=jax.ShapeDtypeStruct((n_splits, bs, nc, nc), jnp.float32),
        grid_spec=pltpu.PrefetchScalarGridSpec(
            num_scalar_prefetch=0,
            grid=(n_splits, bs, kt),
            in_specs=[pl.BlockSpec((1, nc, tk),
                                   lambda s, b, k, kt=kt: (b, 0, s * kt + k))],
            out_specs=pl.BlockSpec((1, 1, nc, nc), lambda s, b, k: (s, b, 0, 0)),
        ),
        compiler_params=pltpu.CompilerParams(
            dimension_semantics=("parallel", "parallel", "arbitrary"),
            vmem_limit_bytes=budget,
        ),
        cost_estimate=cost,
    )(x_flat)
    # Sum partial grams over splits (zero-pad columns contributed nothing).
    return jnp.sum(out, axis=0)


def style_sse_pallas(x, gram_s, tk=None, n_splits=1):
    """Per-batch sum((gram_s - gram(x))^2), shape (B, 1, 1) float32."""
    bs, nc, h, w = x.shape
    gram_s = gram_s.astype(jnp.float32)

    if n_splits > 1:
        # Shard the HW contraction across cores; the nc^2 SSE epilogue is tiny,
        # finish it in plain JAX on the (B, C, C) gram.
        gram_g = gram_pallas(x, tk=tk, n_splits=n_splits)
        diff = gram_s - gram_g
        return jnp.sum(diff * diff, axis=(1, 2)).reshape(bs, 1, 1)

    budget = _vmem_budget_bytes()
    x_flat, tk, kt, hw_pad = _prep_input(x, 1, tk, budget)
    itemsize = x_flat.dtype.itemsize
    inv_norm = 1.0 / float(bs * nc * h * w)

    kernel = functools.partial(_style_sse_kernel, inv_norm=inv_norm)
    cost = pl.CostEstimate(
        flops=2 * bs * nc * nc * hw_pad + 3 * bs * nc * nc,
        transcendentals=0,
        bytes_accessed=bs * nc * hw_pad * itemsize + bs * nc * nc * 4 + bs * 4,
    )
    return pl.pallas_call(
        kernel,
        out_shape=jax.ShapeDtypeStruct((bs, 1, 1), jnp.float32),
        grid_spec=pltpu.PrefetchScalarGridSpec(
            num_scalar_prefetch=0,
            grid=(bs, kt),
            in_specs=[
                pl.BlockSpec((1, nc, tk), lambda b, k: (b, 0, k)),
                pl.BlockSpec(memory_space=pl.ANY),  # gram_S stays in HBM
            ],
            out_specs=pl.BlockSpec((1, 1, 1), lambda b, k: (b, 0, 0)),
            scratch_shapes=[
                pltpu.VMEM((nc, nc), jnp.float32),   # gram accumulator
                pltpu.VMEM((nc, nc), jnp.float32),   # staged gram_S
                pltpu.SemaphoreType.DMA(()),
            ],
        ),
        compiler_params=pltpu.CompilerParams(
            dimension_semantics=("parallel", "arbitrary"),
            vmem_limit_bytes=budget,
        ),
        cost_estimate=cost,
    )(x_flat, gram_s)


class StyleLossPallas:
    """JAX/Pallas equivalent of the PyTorch StyleLoss module."""

    def __init__(self, style, tk=None, n_splits=None):
        self.style = style
        self._tk = tk
        self._n_splits = (_default_n_splits(style.shape[0])
                          if n_splits is None else n_splits)
        # (B, C, C) f32, computed once at init (mirrors gram_S buffer).
        self.gram_S = gram_pallas(style, tk=tk, n_splits=self._n_splits)
        self.loss = None

    def __call__(self, generated, calc_loss=True):
        if calc_loss:
            bs, nc, _, _ = generated.shape
            sse = style_sse_pallas(generated, self.gram_S,
                                   tk=self._tk, n_splits=self._n_splits)
            # F.mse_loss = mean over the B*C*C gram elements.
            self.loss = jnp.sum(sse) / float(bs * nc * nc)
        return generated


# ----------------------------------------------------------------------------
# Reference + tests
# ----------------------------------------------------------------------------
def _reference_loss(style, generated):
    """Pure-JAX reference of the PyTorch semantics."""
    def gram_calc(t):
        bs, nc, h, w = t.shape
        t_ = t.reshape(bs, nc, h * w).astype(jnp.float32)
        return jnp.einsum("bik,bjk->bij", t_, t_) / (bs * nc * h * w)

    g_s = gram_calc(style)
    g_g = gram_calc(generated)
    return jnp.mean((g_s - g_g) ** 2)


if __name__ == "__main__":
    key = jax.random.PRNGKey(0)
    k_style, k_gen, k_style2, k_gen2 = jax.random.split(key, 4)

    # Case 1: B=2, C=4, 16x16 spatial; explicit tk=128 -> 2 K steps per batch.
    style = jax.random.normal(k_style, (2, 4, 16, 16), dtype=jnp.float32)
    generated = jax.random.normal(k_gen, (2, 4, 16, 16), dtype=jnp.float32)
    ref = jax.block_until_ready(_reference_loss(style, generated))

    module = StyleLossPallas(style, tk=128, n_splits=1)
    out = jax.block_until_ready(module(generated, calc_loss=True))
    loss = jax.block_until_ready(module.loss)
    assert out.shape == generated.shape
    assert jnp.allclose(out, generated)
    assert jnp.allclose(loss, ref, rtol=1e-5, atol=1e-6), (loss, ref)

    # Case 2: auto-chosen K tile and split count.
    module2 = StyleLossPallas(style)
    _ = jax.block_until_ready(module2(generated, calc_loss=True))
    loss2 = jax.block_until_ready(module2.loss)
    assert jnp.allclose(loss2, ref, rtol=1e-5, atol=1e-6), (loss2, ref)

    # Case 3: H*W not a multiple of 128 -> zero-padded tiled path.
    style3 = jax.random.normal(k_style2, (2, 4, 10, 10), dtype=jnp.float32)
    gen3 = jax.random.normal(k_gen2, (2, 4, 10, 10), dtype=jnp.float32)
    ref3 = jax.block_until_ready(_reference_loss(style3, gen3))
    module3 = StyleLossPallas(style3)
    _ = jax.block_until_ready(module3(gen3, calc_loss=True))
    loss3 = jax.block_until_ready(module3.loss)
    assert jnp.allclose(loss3, ref3, rtol=1e-5, atol=1e-6), (loss3, ref3)

    # Case 4: explicit 2-way HW split (v7x megacore path) with B=1.
    style4, gen4 = style[:1], generated[:1]
    ref4 = jax.block_until_ready(_reference_loss(style4, gen4))
    module4 = StyleLossPallas(style4, n_splits=2)
    _ = jax.block_until_ready(module4(gen4, calc_loss=True))
    loss4 = jax.block_until_ready(module4.loss)
    assert jnp.allclose(loss4, ref4, rtol=1e-5, atol=1e-6), (loss4, ref4)

    print("KERNEL_OK")
</pallas_src>

<mosaic_0001>
module attributes {stable_mosaic.version = 11 : i64} {
  func.func @_gram_kernel(%arg0: i32, %arg1: i32, %arg2: i32, %arg3: memref<1x4x128xf32, #tpu.memory_space<vmem>>, %arg4: memref<1x1x4x4xf32, #tpu.memory_space<vmem>>) attributes {dimension_semantics = [#tpu.dimension_semantics<parallel>, #tpu.dimension_semantics<parallel>, #tpu.dimension_semantics<arbitrary>], iteration_bounds = array<i64: 1, 2, 2>, scalar_prefetch = 0 : i64, scratch_operands = 0 : i64, tpu.core_type = #tpu.core_type<tc>, window_params = [{transform_indices = @transform_0, window_bounds = array<i64: 1, 4, 128>}, {transform_indices = @transform_1, window_bounds = array<i64: 1, 1, 4, 4>}]} {
    %c0_i32 = arith.constant 0 : i32
    %0 = arith.cmpi eq, %arg2, %c0_i32 : i32
    %1 = arith.extui %0 : i1 to i32
    %c0_i32_0 = arith.constant 0 : i32
    %2 = arith.cmpi ne, %1, %c0_i32_0 : i32
    scf.if %2 {
      %cst_12 = arith.constant 0.000000e+00 : f32
      %15 = vector.broadcast %cst_12 : f32 to vector<1x1x4x4xf32>
      %c0_13 = arith.constant 0 : index
      %c0_14 = arith.constant 0 : index
      %c0_15 = arith.constant 0 : index
      %c0_16 = arith.constant 0 : index
      %16 = vector.load %arg4[%c0_13, %c0_14, %c0_15, %c0_16] : memref<1x1x4x4xf32, #tpu.memory_space<vmem>>, vector<1x1x4x4xf32>
      tpu.vector_store %arg4[%c0_13, %c0_14, %c0_15, %c0_16], %15 {strides = array<i32>} : memref<1x1x4x4xf32, #tpu.memory_space<vmem>>, vector<1x1x4x4xf32>,
    } else {
    }
    %c0 = arith.constant 0 : index
    %c0_1 = arith.constant 0 : index
    %c0_2 = arith.constant 0 : index
    %3 = vector.load %arg3[%c0, %c0_1, %c0_2] : memref<1x4x128xf32, #tpu.memory_space<vmem>>, vector<1x4x128xf32>
    %4 = vector.shape_cast %3 : vector<1x4x128xf32> to vector<4x128xf32>
    %c0_3 = arith.constant 0 : index
    %c0_4 = arith.constant 0 : index
    %c0_5 = arith.constant 0 : index
    %c0_6 = arith.constant 0 : index
    %5 = vector.load %arg4[%c0_3, %c0_4, %c0_5, %c0_6] : memref<1x1x4x4xf32, #tpu.memory_space<vmem>>, vector<1x1x4x4xf32>
    %6 = vector.shape_cast %5 : vector<1x1x4x4xf32> to vector<4x4xf32>
    %cst = arith.constant dense<0.000000e+00> : vector<4x4xf32>
    %7 = tpu.matmul %4, %4, %cst {dimension_numbers = #tpu.dot_dimension_numbers<[1], [1], [0], [0], [0, 0, 1, 0], [], []>} : vector<4x128xf32>, vector<4x128xf32>, vector<4x4xf32> -> vector<4x4xf32>
    %8 = arith.addf %6, %7 : vector<4x4xf32>
    %c0_7 = arith.constant 0 : index
    %c0_8 = arith.constant 0 : index
    %c0_9 = arith.constant 0 : index
    %c0_10 = arith.constant 0 : index
    %9 = vector.load %arg4[%c0_7, %c0_8, %c0_9, %c0_10] : memref<1x1x4x4xf32, #tpu.memory_space<vmem>>, vector<1x1x4x4xf32>
    %10 = vector.shape_cast %9 : vector<1x1x4x4xf32> to vector<4x4xf32>
    %11 = vector.shape_cast %8 : vector<4x4xf32> to vector<1x1x4x4xf32>
    tpu.vector_store %arg4[%c0_7, %c0_8, %c0_9, %c0_10], %11 {strides = array<i32>} : memref<1x1x4x4xf32, #tpu.memory_space<vmem>>, vector<1x1x4x4xf32>,
    %c1_i32 = arith.constant 1 : i32
    %12 = arith.cmpi eq, %arg2, %c1_i32 : i32
    %13 = arith.extui %12 : i1 to i32
    %c0_i32_11 = arith.constant 0 : i32
    %14 = arith.cmpi ne, %13, %c0_i32_11 : i32
    scf.if %14 {
      %c0_12 = arith.constant 0 : index
      %c0_13 = arith.constant 0 : index
      %c0_14 = arith.constant 0 : index
      %c0_15 = arith.constant 0 : index
      %15 = vector.load %arg4[%c0_12, %c0_13, %c0_14, %c0_15] : memref<1x1x4x4xf32, #tpu.memory_space<vmem>>, vector<1x1x4x4xf32>
      %cst_16 = arith.constant 4.8828125E-4 : f32
      %16 = vector.broadcast %cst_16 : f32 to vector<1x1x4x4xf32>
      %17 = arith.mulf %15, %16 : vector<1x1x4x4xf32>
      %c0_17 = arith.constant 0 : index
      %c0_18 = arith.constant 0 : index
      %c0_19 = arith.constant 0 : index
      %c0_20 = arith.constant 0 : index
      %18 = vector.load %arg4[%c0_17, %c0_18, %c0_19, %c0_20] : memref<1x1x4x4xf32, #tpu.memory_space<vmem>>, vector<1x1x4x4xf32>
      tpu.vector_store %arg4[%c0_17, %c0_18, %c0_19, %c0_20], %17 {strides = array<i32>} : memref<1x1x4x4xf32, #tpu.memory_space<vmem>>, vector<1x1x4x4xf32>,
    } else {
    }
    return
  }
  func.func @transform_0(%arg0: i32, %arg1: i32, %arg2: i32) -> (i32, i32, i32) {
    %c2_i32 = arith.constant 2 : i32
    %0 = arith.muli %arg0, %c2_i32 : i32
    %1 = arith.addi %0, %arg2 : i32
    %c0_i32 = arith.constant 0 : i32
    %c0_i32_0 = arith.constant 0 : i32
    return %arg1, %c0_i32, %1 : i32, i32, i32
  }
  func.func @transform_1(%arg0: i32, %arg1: i32, %arg2: i32) -> (i32, i32, i32, i32) {
    %c0_i32 = arith.constant 0 : i32
    %c0_i32_0 = arith.constant 0 : i32
    %c0_i32_1 = arith.constant 0 : i32
    return %arg0, %arg1, %c0_i32, %c0_i32_0 : i32, i32, i32, i32
  }
}

</mosaic_0001>

<bundles_post_ra>
// kernel: tpu_custom_call.1
= control target key start
LH: loop header
LB: loop body
LE: loop exit
PB: predicated region body
PF: predicated region fallthrough
CT: control target
= control target key end

     0   :  { %6 = vsyncpa [#allocation3], 0  ;;  %s765_s0 = inlined_call_operand.hbm [shape: f32[2,4,256], index: 0, kind: input, shape index: {}]   ;;  %s766_s1 = inlined_call_operand.hbm [shape: f32[1,2,4,4], index: 1, kind: output, shape index: {}]  }
   0x1   :  { %8 = vsyncpa [#allocation3 + $0x1], 0 }
   0x2   :  { %9 = vsyncpa [#allocation4], 0 }
   0x3   :  { %11 = vsyncpa [#allocation4 + $0x1], 0  ;;  %s597_s6 = smov 0   ;;  %s599_s7 = smov 0  }
   0x4   :  { %s601_s8 = smov 0   ;;  %s603_s9 = smov 0  }
   0x5   :  { %s605_s10 = smov 0   ;;  %s607_s11 = smov 0  }
   0x6   :  { %s609_s12 = smov 0   ;;  %s611_s13 = smov 0  }
   0x7   :  { %s613_s14 = smov 0   ;;  %s615_s15 = smov 0  }
   0x8   :  { %s617_s16 = smov 0  }
   0x9 LB: > { %s313_s17 = sadd.s32 4294967295, %s584_s16   ;;  %s314_s18 = sadd.s32 4294967294, %s584_s16   ;;  %s584_s16 = sphi %s617_s16, %s17_s16   ;;  %s580_s15 = sphi %s615_s15, %s783_s15   ;;  %s576_s14 = sphi %s613_s14, %s782_s14   ;;  %s572_s13 = sphi %s611_s13, %s781_s13   ;;  %s568_s12 = sphi %s609_s12, %s780_s12   ;;  %s564_s11 = sphi %s607_s11, %s779_s11   ;;  %s560_s10 = sphi %s605_s10, %s778_s10   ;;  %s556_s9 = sphi %s603_s9, %s777_s9   ;;  %s552_s8 = sphi %s601_s8, %s776_s8   ;;  %s548_s7 = sphi %s599_s7, %s775_s7   ;;  %s544_s6 = sphi %s597_s6, %s774_s6  }
   0xa   : > { %s29_s19 = sadd.s32 1, %s576_s14  ;;  %s32_s20 = sadd.s32 1, %s580_s15 }
   0xb   : > { %p30_p0 = scmp.ge.s32.totalorder %s29_s19, 2  ;;  %s49_s21 = sadd.s32 1, %s564_s11 }
   0xc   : > { %p56_p1 = scmp.ne.s32.totalorder %s564_s11, %s560_s10  ;;  %p57_p2 = scmp.eq.s32.totalorder %s584_s16, 0 }
   0xd   : > { %s785_s19 = smov (%p30_p0, %s29_s19), 0  ;;  %s787_s20 = smov (!%p30_p0, %s32_s20), %s580_s15 }
   0xe   : > { %s45_s22 = ssub.s32 %s576_s14, %s785_s19  ;;  %p663_p3 = por %p57_p2, %p56_p1 }
   0xf   : > { %p34_p4 = scmp.ge.s32.totalorder %s787_s20, 2  ;;  %p62_p5 = scmp.ne.s32.totalorder %s560_s10, %s556_s9 }
  0x10   : > { %p63_p6 = scmp.eq.s32.totalorder %s313_s17, 0  ;;  %s77_s24 = sadd.s32 1, %s552_s8 }
  0x11   : > { %s789_s20 = smov (%p34_p4, %s787_s20), 0  ;;  %p87_p8 = scmp.ne.s32.totalorder %s552_s8, %s548_s7 }
  0x12   : > { %769 = sst [smem:[#allocation8_spill]] %s789_s20  ;;  %p671_p7 = por %p63_p6, %p62_p5 }
  0x13   : > { %s44_s26 = ssub.s32 %s580_s15, %s789_s20  ;;  %p88_p9 = scmp.eq.s32.totalorder %s313_s17, 3 }
  0x14   : > { %s46_s27 = sor.u32 %s45_s22, %s44_s26  ;;  %p75_p10 = scmp.eq.s32.totalorder %s44_s26, 0 }
  0x15   : > { %p47_p11 = scmp.eq.s32.totalorder %s46_s27, 0  ;;  %p679_p12 = por %p88_p9, %p87_p8 }
  0x16   : > { %s684_s29 = scalar_select %p75_p10, %s552_s8, %s77_s24  }
  0x17   : > { %s687_s30 = scalar_select %p47_p11, %s564_s11, %s49_s21  }
  0x18   : > { %p93_p13 = scmp.ne.s32.totalorder %s548_s7, %s544_s6  ;;  %p94_p0 = scmp.eq.s32.totalorder %s314_s18, 3 }
  0x19   : > { %p341_p1 = scmp.lt.s32.totalorder %s584_s16, 4  ;;  %s114_s3 = sand.u32 1, %s564_s11  }
  0x1a   : > { %p692_p2 = por %p94_p0, %p93_p13  ;;  %s317_s4 = sshll.u32 %s114_s3, 2 }
  0x1b   : > { %s318_s5 = sshll.u32 %s580_s15, 1  ;;  %s118_s17 = scalar_lea.vmem [#allocation2], %s317_s4 }
  0x1c   : > { %s124_s9 = sadd.s32 %s576_s14, %s318_s5  ;;  %s130_s22 = sshll.u32 %s118_s17, 4  ;;  %s131_s22 = int_to_ptr.vmem [resolvable:$true] %s130_s22 }
  0x1d   : > { %s319_s26 = sshll.u32 %s124_s9, 2  ;;  %p334_p4 = pnand %p341_p1, %p663_p3 }
  0x1e   : > { %s126_s27 = scalar_lea.hbm %s765_s0, %s319_s26  ;;  %p320_p5 = scmp.ge.s32.totalorder %s584_s16, 1 }
  0x1f   : > { %s128_s18 = sshll.u32 %s126_s27, 4  ;;  %s115_s20 = scalar_lea.sflag [#allocation3], %s114_s3  ;;  %s129_s18 = int_to_ptr.hbm [resolvable:$true] %s128_s18 }
  0x20   : > { %336 = dma.hbm_to_vmem [thread:$0]  (!%p334_p4), %s129_s18, 64, %s131_s22, %s115_s20  }
  0x21   : > { %p135_p6 = scmp.lt.s32.totalorder %s584_s16, 5 }
  0x23   : > { %p136_p8 = pnand %p320_p5, %p135_p6 }
  0x24   : > { %s141_s4 = sand.u32 (!%p136_p8), 1, %s560_s10  }
  0x25   : > { %139 = sbr.rel (%p136_p8) target bundleno = 210 (0xd2), region = 24  ;;  %s321_s5 = sshll.u32 (!%p136_p8), %s141_s4, 2 }
  0x26   : > { %s142_s9 = scalar_lea.sflag (!%p136_p8), [#allocation3], %s141_s4  ;;  %s145_s17 = scalar_lea.vmem (!%p136_p8), [#allocation2], %s321_s5 }
  0x2a   : > { %535 = dma.done.wait (%p671_p7), %s142_s9, 64  }
  0x2b   : > { %537 = vsyncadd (%p671_p7), %s142_s9, 4294967232  ;;  %s162_s23 = sand.u32 1, %s548_s7   ;;  %p323_p3 = scmp.ne.s32.totalorder %s568_s12, 0 }
  0x2c   : > { %s322_s26 = sshll.u32 %s162_s23, 2 }
  0x2d   : > { %s164_s24 = scalar_lea.vmem [#allocation5], %s322_s26  ;;  %170 = sbr.rel (%p323_p3) target bundleno = 52 (0x34), region = 32 }
  0x32   : > { %vm171_vm0 = vcmask 27648   ;;  %v586_v0 = vmov 0.0  }
  0x33   : > { %172 = vst.msk [vmem:[%s164_s24] sm:$0xf] %vm171_vm0, %v586_v0 }
  0x34 PF: > { %v173_v1 = vld [vmem:[%s145_s17] sm:$0xf]  ;;  %vm196_vm1 = vcmask 27648   ;;  %p324_p7 = scmp.ne.s32.totalorder %s568_s12, 1 }
  0x35   : > { %190 = vmatpush.xpose.msra.mxu0 %v173_v1 }
  0x38   : > { %191 = vmatmul.f32.vlgmr.msra.gmra.mxu0 %v173_v1 }
  0x3a   : > { %v174_v2 = vld [vmem:[%s164_s24] sm:$0xf] }
  0xb4   : > { %201 = sbr.rel (%p324_p7) target bundleno = 195 (0xc3), region = 36 }
  0xb5   : > { %v192_v3 = vpop.f32.mrf.mxu0 }
  0xb6   : > { %v195_v4 = vadd.f32 %v192_v3, %v174_v2 }
  0xb8   : > { %197 = vst.msk [vmem:[%s164_s24] sm:$0xf] %vm196_vm1, %v195_v4 }
  0xbf   : > { %v202_v5 = vld [vmem:[%s164_s24] sm:$0xf] }
  0xc0   : > { %v203_v6 = vmul.f32 0.00048828125, %v202_v5 }
  0xc2   : > { %204 = vst.msk [vmem:[%s164_s24] sm:$0xf] %vm196_vm1, %v203_v6 }
  0xc3 PF: > { %s326_s20 = sshll.u32 %s572_s13, 2  ;;  %s220_s21 = sshll.u32 %s164_s24, 4  ;;  %s221_s21 = int_to_ptr.vmem [resolvable:$true] %s220_s21 }
  0xc4   : > { %s218_s22 = scalar_lea.hbm %s766_s1, %s326_s20  ;;  %s206_s18 = scalar_lea.sflag [#allocation4], %s162_s23 }
  0xc5   : > { %s222_s27 = sshll.u32 %s218_s22, 4  ;;  %s482_s13 = scalar_lea.hbm %s766_s1, 8  ;;  %s223_s27 = int_to_ptr.hbm [resolvable:$true] %s222_s27 }
  0xc6   : > { %s476_s4 = sshra.s32 %s223_s27, 4  ;;  %s477_s4 = int_to_ptr.hbm [resolvable:$true] %s476_s4 }
  0xc7   : > { %s478_s12 = scalar_lea.hbm %s477_s4, 4  ;;  %p483_p13 = scmp.lt.s32.totalorder %s477_s4, %s766_s1 }
  0xc8   : > { %p479_p9 = scmp.ne.s32.totalorder %s477_s4, %s478_s12  ;;  %p484_p0 = scmp.lt.s32.totalorder %s482_s13, %s478_s12 }
  0xca   : > { %p480_p10 = pnand %p479_p9, %p679_p12  ;;  %p485_p1 = por %p484_p0, %p483_p13 }
  0xcc   : > { %p481_p11 = pneg %p480_p10 }
  0xce   : > { %p486_p4 = pnand %p485_p1, %p481_p11 }
  0xd0   : > { %489 = shalt.err (!%p486_p4)
}
  0xd1   : > { %331 = dma.vmem_to_hbm [thread:$0]  (%p679_p12), %s221_s21, 64, %s223_s27, %s206_s18  }
  0xd2 PF: > { %p342_p5 = scmp.ge.s32.totalorder %s584_s16, 2  ;;  %s234_s23 = sand.u32 1, %s544_s6  }
  0xd3   : > { %s235_s24 = scalar_lea.sflag [#allocation4], %s234_s23 }
  0xd4   : > { %p338_p6 = pnand %p342_p5, %p692_p2 }
  0xd6   : > { %p339_p8 = pneg %p338_p6 }
  0xd8   : > { %539 = dma.done.wait (%p339_p8), %s235_s24, 64  }
  0xd9   : > { %541 = vsyncadd (%p339_p8), %s235_s24, 4294967232  ;;  %s17_s16 = sadd.s32 1, %s584_s16   ;;  %s773_s28 = sld [smem:[#allocation8_spill]] }
  0xda   : > { %p14_p3 = scmp.ge.s32.totalorder %s17_s16, 6   ;;  %s774_s6 = smov %s548_s7 }
  0xdb   : > { %s775_s7 = smov %s552_s8  ;;  %s776_s8 = smov %s684_s29 }
  0xdc   : > { %s777_s9 = smov %s560_s10  ;;  %s778_s10 = smov %s564_s11 }
  0xdd   : > { %s779_s11 = smov %s687_s30  ;;  %s780_s12 = smov %s576_s14 }
  0xde   : > { %s781_s13 = smov %s580_s15  ;;  %s782_s14 = smov %s785_s19 }
  0xdf   : > { %s783_s15 = smov %s773_s28  ;;  %16 = sbr.rel (!%p14_p3) target bundleno = 9 (0x9), region = 77 }
  0xe4   :  { %241 = vsyncpa [#allocation3], 1 }
  0xe5   :  { %243 = vsyncpa [#allocation3 + $0x1], 1 }
  0xe6   :  { %244 = vsyncpa [#allocation4], 1 }
  0xe7   :  { %246 = vsyncpa [#allocation4 + $0x1], 1 }

</bundles_post_ra>
